<compile_context>
chip_gen: v7x
topology: tpu7x:2x2x1
jax: 0.10.0
libtpu: 0.0.40
codegen_flags: <defaults>
</compile_context>

<pallas_src>
import jax
import jax.numpy as jnp
from jax.experimental import pallas as pl
from jax.experimental.pallas import tpu as pltpu


def _cheb_kernel(adj_ref, x_ref, theta_ref, o_ref):
    # adj_ref:   (B*N, N)          row-major flatten of adj (input reshape, free)
    # x_ref:     (B*N, F_in)       row-major flatten of x
    # theta_ref: (K, F_in, F_out)
    # o_ref:     (B*N, F_out)
    BN, N = adj_ref.shape
    B = BN // N

    # --- review #2: K-reduction of Theta in-kernel (K-1 elementwise VPU adds). -
    theta_sum = theta_ref[0]
    for k in range(1, theta_ref.shape[0]):            # static unroll, K is tiny
        theta_sum = theta_sum + theta_ref[k]           # (F_in, F_out)

    # --- review #5: Theta contraction first — single 2-D MXU matmul over all ---
    # B*N rows at once.  No computed-value reshape anywhere in the kernel.
    xt = jnp.dot(x_ref[...], theta_sum,
                 preferred_element_type=jnp.float32)            # (B*N, F_out) f32

    # --- review #4: fuse the B per-batch adj matmuls into ONE MXU call by ------
    # building a (B*N, B*N) block-diagonal adj in VMEM:
    #   adj_bd[b*N+i, b*N+j] = adj[b, i, j],  zero off the diagonal blocks.
    # Construction uses only iota / compare / select / concat (no int division,
    # no gathers): column-block b keeps exactly the adj rows belonging to batch b.
    adj_flat = adj_ref[...]                                      # (B*N, N)
    row_idx = jax.lax.broadcasted_iota(jnp.int32, (BN, N), 0)
    pieces = []
    for b in range(B):                                           # static unroll
        in_block = (row_idx >= b * N) & (row_idx < (b + 1) * N)
        pieces.append(jnp.where(in_block, adj_flat, 0.0))
    adj_bd = jnp.concatenate(pieces, axis=-1)                    # (B*N, B*N)

    out = jnp.dot(adj_bd, xt.astype(adj_bd.dtype),
                  preferred_element_type=jnp.float32)            # (B*N, F_out)

    # F_out (=32) is < 128 lanes -> masked stores; negligible at this size.
    # (review #8: pad/pack F_out to a multiple of 128 if channels scale up.)
    o_ref[...] = jnp.maximum(out, 0.0).astype(o_ref.dtype)


def cheb_conv_k(x, adj, theta, *, compute_dtype=jnp.float32):
    """x: (B, N, F_in), adj: (B, N, N), theta: (K, F_in, F_out) -> (B, N, F_out).

    compute_dtype=jnp.bfloat16 halves HBM/VMEM bytes and runs the MXU single-pass
    at scaled-up shapes (review #3); default f32 matches the f64-weight reference
    as closely as TPU allows.
    """
    B, N, F_in = x.shape
    K, F_in2, F_out = theta.shape
    assert F_in2 == F_in
    # torch's `output = zeros_like(x); output += matmul(...)` requires F_out == F_in
    assert F_out == F_in, "cheb_conv_K as written requires in_channels == out_channels"
    assert adj.shape == (B, N, N)
    # Block-diagonal fusion is O((B*N)^2) VMEM — intended for module-scale shapes.
    assert B * N <= 1024, "use a tiled/batched path for large B*N (see TODOs)"

    # Leading-dim merges of INPUTS only (metadata-level in XLA, no data movement).
    adj_flat = adj.reshape(B * N, N).astype(compute_dtype)
    x_flat = x.reshape(B * N, F_in).astype(compute_dtype)
    theta_c = theta.astype(compute_dtype)

    # review #1: grid-less pallas_call — the whole problem lives in VMEM for one
    # kernel invocation: no pipeline machinery, no double-buffering, a single DMA
    # in/out per operand.
    out_flat = pl.pallas_call(
        _cheb_kernel,
        out_shape=jax.ShapeDtypeStruct((B * N, F_out), jnp.float32),
        in_specs=[
            pl.BlockSpec(memory_space=pltpu.MemorySpace.VMEM),   # adj_flat
            pl.BlockSpec(memory_space=pltpu.MemorySpace.VMEM),   # x_flat
            pl.BlockSpec(memory_space=pltpu.MemorySpace.VMEM),   # theta (K,F,F)
        ],
        out_specs=pl.BlockSpec(memory_space=pltpu.MemorySpace.VMEM),
    )(adj_flat, x_flat, theta_c)

    # Metadata-only reshape back to (B, N, F_out) outside the kernel.
    return out_flat.reshape(B, N, F_out)


def cheb_conv_k_ref(x, adj, theta):
    """Pure-JAX reference matching the torch loop exactly."""
    K = theta.shape[0]
    out = jnp.zeros_like(x)
    for k in range(K):
        rhs = jnp.einsum("bij,bjf->bif", adj, x)
        out = out + jnp.matmul(rhs, theta[k])
    return jax.nn.relu(out)


if __name__ == "__main__":
    # Small shapes consistent with the module: batch=2, class(nodes)=16,
    # in_channels=out_channels=32, K=3.
    B, N, C, K = 2, 16, 32, 3

    key = jax.random.PRNGKey(0)
    kx, kadj, kth = jax.random.split(key, 3)

    x = jax.random.normal(kx, (B, N, C), dtype=jnp.float32)
    adj = jax.random.normal(kadj, (B, N, N), dtype=jnp.float32)
    theta = jax.random.normal(kth, (K, C, C), dtype=jnp.float32) * 0.1

    out = jax.block_until_ready(cheb_conv_k(x, adj, theta))

    ref = cheb_conv_k_ref(x, adj, theta)
    assert out.shape == (B, N, C)
    # Summation order differs from the reference loop (Theta pre-summed, algebra
    # reordered), so compare at normal f32 tolerance.
    assert jnp.allclose(out, ref, atol=1e-4, rtol=1e-4), "mismatch vs reference"

    print("KERNEL_OK")
</pallas_src>

<mosaic_0001>
module attributes {stable_mosaic.version = 11 : i64} {
  func.func @_cheb_kernel(%arg0: memref<32x16xf32, #tpu.memory_space<vmem>>, %arg1: memref<32x32xf32, #tpu.memory_space<vmem>>, %arg2: memref<3x32x32xf32, #tpu.memory_space<vmem>>, %arg3: memref<32x32xf32, #tpu.memory_space<vmem>>) attributes {dimension_semantics = [], scalar_prefetch = 0 : i64, scratch_operands = 0 : i64, tpu.core_type = #tpu.core_type<tc>} {
    %c0 = arith.constant 0 : index
    %c0_0 = arith.constant 0 : index
    %c0_1 = arith.constant 0 : index
    %0 = vector.load %arg2[%c0, %c0_0, %c0_1] : memref<3x32x32xf32, #tpu.memory_space<vmem>>, vector<1x32x32xf32>
    %1 = vector.shape_cast %0 : vector<1x32x32xf32> to vector<32x32xf32>
    %c1 = arith.constant 1 : index
    %c0_2 = arith.constant 0 : index
    %c0_3 = arith.constant 0 : index
    %2 = vector.load %arg2[%c1, %c0_2, %c0_3] : memref<3x32x32xf32, #tpu.memory_space<vmem>>, vector<1x32x32xf32>
    %3 = vector.shape_cast %2 : vector<1x32x32xf32> to vector<32x32xf32>
    %4 = arith.addf %1, %3 : vector<32x32xf32>
    %c2 = arith.constant 2 : index
    %c0_4 = arith.constant 0 : index
    %c0_5 = arith.constant 0 : index
    %5 = vector.load %arg2[%c2, %c0_4, %c0_5] : memref<3x32x32xf32, #tpu.memory_space<vmem>>, vector<1x32x32xf32>
    %6 = vector.shape_cast %5 : vector<1x32x32xf32> to vector<32x32xf32>
    %7 = arith.addf %4, %6 : vector<32x32xf32>
    %c0_6 = arith.constant 0 : index
    %c0_7 = arith.constant 0 : index
    %8 = vector.load %arg1[%c0_6, %c0_7] : memref<32x32xf32, #tpu.memory_space<vmem>>, vector<32x32xf32>
    %cst = arith.constant dense<0.000000e+00> : vector<32x32xf32>
    %9 = tpu.matmul %8, %7, %cst {dimension_numbers = #tpu.dot_dimension_numbers<[1], [0], [0], [1], [0, 0, 1, 1], [], []>} : vector<32x32xf32>, vector<32x32xf32>, vector<32x32xf32> -> vector<32x32xf32>
    %c0_8 = arith.constant 0 : index
    %c0_9 = arith.constant 0 : index
    %10 = vector.load %arg0[%c0_8, %c0_9] : memref<32x16xf32, #tpu.memory_space<vmem>>, vector<32x16xf32>
    %11 = tpu.iota {dimensions = array<i32: 0>} : vector<32x16xi32>
    %c0_i32 = arith.constant 0 : i32
    %12 = vector.broadcast %c0_i32 : i32 to vector<32x16xi32>
    %13 = arith.cmpi sge, %11, %12 : vector<32x16xi32>
    %c16_i32 = arith.constant 16 : i32
    %14 = vector.broadcast %c16_i32 : i32 to vector<32x16xi32>
    %15 = arith.cmpi slt, %11, %14 : vector<32x16xi32>
    %16 = arith.andi %13, %15 : vector<32x16xi1>
    %cst_10 = arith.constant 0.000000e+00 : f32
    %17 = vector.broadcast %cst_10 : f32 to vector<32x16xf32>
    %18 = arith.select %16, %10, %17 : vector<32x16xi1>, vector<32x16xf32>
    %c16_i32_11 = arith.constant 16 : i32
    %19 = vector.broadcast %c16_i32_11 : i32 to vector<32x16xi32>
    %20 = arith.cmpi sge, %11, %19 : vector<32x16xi32>
    %c32_i32 = arith.constant 32 : i32
    %21 = vector.broadcast %c32_i32 : i32 to vector<32x16xi32>
    %22 = arith.cmpi slt, %11, %21 : vector<32x16xi32>
    %23 = arith.andi %20, %22 : vector<32x16xi1>
    %cst_12 = arith.constant 0.000000e+00 : f32
    %24 = vector.broadcast %cst_12 : f32 to vector<32x16xf32>
    %25 = arith.select %23, %10, %24 : vector<32x16xi1>, vector<32x16xf32>
    %26 = tpu.concatenate %18, %25 in 1 : vector<32x16xf32>, vector<32x16xf32> -> vector<32x32xf32>
    %cst_13 = arith.constant dense<0.000000e+00> : vector<32x32xf32>
    %27 = tpu.matmul %26, %9, %cst_13 {dimension_numbers = #tpu.dot_dimension_numbers<[1], [0], [0], [1], [0, 0, 1, 1], [], []>} : vector<32x32xf32>, vector<32x32xf32>, vector<32x32xf32> -> vector<32x32xf32>
    %cst_14 = arith.constant 0.000000e+00 : f32
    %28 = vector.broadcast %cst_14 : f32 to vector<32x32xf32>
    %29 = arith.maximumf %27, %28 : vector<32x32xf32>
    %c0_15 = arith.constant 0 : index
    %c0_16 = arith.constant 0 : index
    %30 = vector.load %arg3[%c0_15, %c0_16] : memref<32x32xf32, #tpu.memory_space<vmem>>, vector<32x32xf32>
    tpu.vector_store %arg3[%c0_15, %c0_16], %29 {strides = array<i32>} : memref<32x32xf32, #tpu.memory_space<vmem>>, vector<32x32xf32>,
    return
  }
}

</mosaic_0001>

<bundles_post_ra>
// kernel: tpu_custom_call.1
= control target key start
LH: loop header
LB: loop body
LE: loop exit
PB: predicated region body
PF: predicated region fallthrough
CT: control target
= control target key end

     0   :  { %8 = vsyncpa [#allocation3], 0  ;;  %s560_s0 = inlined_call_operand.vmem [shape: f32[32,16], index: 0, kind: input, shape index: {}]   ;;  %s561_s1 = inlined_call_operand.vmem [shape: f32[32,32], index: 1, kind: input, shape index: {}]   ;;  %s562_s2 = inlined_call_operand.hbm [shape: f32[3,32,32], index: 2, kind: input, shape index: {}]   ;;  %s563_s3 = inlined_call_operand.hbm [shape: f32[32,32], index: 3, kind: output, shape index: {}]  }
   0x1   :  { %9 = vsyncpa [#allocation4], 0  ;;  %s464_s12 = smov [#allocation2]   ;;  %s416_s16 = scalar_lea.hbm %s562_s2, 1536 }
   0x2   :  { %s19_s13 = sshll.u32 %s464_s12, 4  ;;  %p417_p0 = scmp.ne.s32.totalorder %s562_s2, %s416_s16  ;;  %s20_s13 = int_to_ptr.vmem [resolvable:$true] %s19_s13 }
   0x3   :  { %p420_p1 = scmp.lt.u32.totalorder %s416_s16, %s562_s2 }
   0x5   :  { %p422_p2 = pnand %p420_p1, %p417_p0 }
   0x7   :  { %425 = shalt.err (!%p422_p2)
}
   0x8   :  { %s426_s21 = scalar_lea.vmem %s20_s13, 1536  ;;  %p431_p4 = scmp.lt.s32.totalorder %s20_s13, %s20_s13 }
   0x9   :  { %p427_p3 = scmp.ne.s32.totalorder %s20_s13, %s426_s21  ;;  %p432_p5 = scmp.lt.s32.totalorder %s426_s21, %s426_s21 }
   0xb   :  { %p433_p6 = por %p432_p5, %p431_p4 }
   0xd   :  { %p434_p7 = pnand %p433_p6, %p427_p3 }
   0xf   :  { %437 = shalt.err (!%p434_p7)
}
  0x10   :  { %s465_s22 = smov 128   ;;  %s466_s23 = smov 8  }
  0x11   :  { %25 = dma.hbm_to_vmem [thread:$0]  %s562_s2, 1536, %s20_s13, [#allocation3], %s465_s22, %s465_s22, %s466_s23  }
  0x12   :  { %460 = dma.done.wait [#allocation3], 1536  }
  0x13   :  { %461 = vsyncadd [#allocation3], 4294965760  ;;  %v467_v0 = vmov 0.0   ;;  %s468_s26 = smov 16   ;;  %v29_v1 = vld [vmem:[#allocation2] sm:$0xff]  ;;  %v30_v2 = vld [vmem:[#allocation2 + $0x8] sm:$0xff] }
  0x14   :  { %412 = vrot.lane.b32.xlu0 %v467_v0, %s468_s26  ;;  %v34_v3 = vld [vmem:[#allocation2 + $0x20] sm:$0xff]  ;;  %v35_v4 = vld [vmem:[#allocation2 + $0x28] sm:$0xff]  ;;  %v31_v9 = vld [vmem:[#allocation2 + $0x10] sm:$0xff]  ;;  %vm55_vm0 = vcmask 261120   ;;  %vm210_vm1 = vcmask 130048  }
  0x15   :  { %v38_v5 = vadd.f32 %v34_v3, %v29_v1  ;;  %v43_v6 = vld [vmem:[#allocation2 + $0x40] sm:$0xff]  ;;  %v44_v7 = vld [vmem:[#allocation2 + $0x48] sm:$0xff]  ;;  %v39_v8 = vadd.f32 %v35_v4, %v30_v2  ;;  %v32_v10 = vld [vmem:[#allocation2 + $0x18] sm:$0xff] }
  0x16   :  { %v36_v11 = vld [vmem:[#allocation2 + $0x30] sm:$0xff]  ;;  %v37_v13 = vld [vmem:[#allocation2 + $0x38] sm:$0xff]  ;;  %v51_v19 = vld [vmem:[%s561_s1] sm:$0xff] }
  0x17   :  { %v47_v12 = vadd.f32 %v43_v6, %v38_v5  ;;  %v40_v14 = vadd.f32 %v36_v11, %v31_v9  ;;  %v45_v15 = vld [vmem:[#allocation2 + $0x50] sm:$0xff]  ;;  %v46_v16 = vld [vmem:[#allocation2 + $0x58] sm:$0xff]  ;;  %v48_v17 = vadd.f32 %v44_v7, %v39_v8  ;;  %v41_v18 = vadd.f32 %v37_v13, %v32_v10  ;;  %369 = vmatprep.mubr.msk.f32.mxu0 %vm55_vm0, %v51_v19  ;;  %v52_v26 = vld [vmem:[%s561_s1 + $0x8] sm:$0xff] }
  0x18   :  { %v155_v21 = vld [vmem:[%s560_s0 + $0x10] sm:$0xff]  ;;  %v156_v22 = vld [vmem:[%s560_s0 + $0x18] sm:$0xff]  ;;  %v153_v30 = vld [vmem:[%s560_s0] sm:$0xff] }
  0x19   :  { %v49_v20 = vadd.f32 %v45_v15, %v40_v14  ;;  %v389_v23 = vpack.c.bf16 %v48_v17, %v47_v12  ;;  %v50_v24 = vadd.f32 %v46_v16, %v41_v18  ;;  %202 = vrot.lane.b32.xlu0 %v155_v21, %s468_s26  ;;  %204 = vrot.lane.b32.xlu1 %v156_v22, %s468_s26  ;;  %v53_v27 = vld [vmem:[%s561_s1 + $0x10] sm:$0xff]  ;;  %v54_v28 = vld [vmem:[%s561_s1 + $0x18] sm:$0xff] }
  0x1a   :  { %v154_v31 = vld [vmem:[%s560_s0 + $0x8] sm:$0xff]  ;;  %s469_s0 = smov [#allocation5]  }
  0x1b   :  { %390 = vmatprep.subr.bf16.mxu0 %v389_v23  ;;  %v393_v25 = vpack.c.bf16 %v50_v24, %v49_v20  ;;  %s325_s1 = sshll.u32 %s469_s0, 4  ;;  %s326_s1 = int_to_ptr.vmem [resolvable:$true] %s325_s1 }
  0x1c   :  { %392 = vmatpush3.bf16.msra.mxu0 %v389_v23  ;;  %s438_s15 = scalar_lea.vmem %s326_s1, 512  ;;  %p443_p9 = scmp.lt.s32.totalorder %s326_s1, %s326_s1 }
  0x1d   :  { %394 = vmatprep.subr.bf16.mxu0 %v393_v25  ;;  %p439_p8 = scmp.ne.s32.totalorder %s326_s1, %s438_s15  ;;  %p444_p10 = scmp.lt.s32.totalorder %s438_s15, %s438_s15 }
  0x1f   :  { %p445_p11 = por %p444_p10, %p443_p9 }
  0x20   :  { %396 = vmatpush3.bf16.msra.mxu0 %v393_v25 }
  0x21   :  { %p446_p12 = pnand %p445_p11, %p439_p8 }
  0x23   :  { %370 = vmatmul.mubr.msk.f32.vlgmr.msra.gmra.mrb[0].mxu0 %vm55_vm0, %v52_v26 }
  0x24   :  { %372 = vmatprep.mubr.msk.f32.mxu0 %vm55_vm0, %v53_v27 }
  0x27   :  { %373 = vmatmul.mubr.msk.f32.gmra.mrb[2].mxu0 %vm55_vm0, %v54_v28 }
  0x86   :  { %v413_v29 = vpop.permute.xlu0 %412 }
  0x87   :  { %v415_v32 = vunpack.i.h.bf16 %v413_v29  ;;  %v414_v33 = vunpack.i.l.bf16 %v413_v29 }
  0x89   :  { %v211_v34 = vsel %vm210_vm1, %v153_v30, %v414_v33  ;;  %v212_v35 = vsel %vm210_vm1, %v154_v31, %v415_v32 }
  0x8a   :  { %383 = vmatprep.mubr.msk.f32.mxu1 %vm55_vm0, %v211_v34 }
  0x8b   :  { %v203_v42 = vpop.permute.xlu0 %202  ;;  %v205_v44 = vpop.permute.xlu1 %204 }
  0x8c   :  { %v213_v43 = vsel %vm210_vm1, 0.0, %v203_v42  ;;  %v214_v45 = vsel %vm210_vm1, 0.0, %v205_v44 }
  0xf6   :  { %v371_v36 = vpop.f32.mrb[0].mxu0 }
  0xf7   :  { %v134_v37 = vpop.f32.mrb[1].mxu0 }
  0xf8   :  { %v397_v38 = vpack.c.bf16 %v371_v36, %v134_v37 }
  0xfa   :  { %v374_v39 = vpop.f32.mrb[2].mxu0  ;;  %398 = vmatprep.subr.bf16.mxu1 %v397_v38 }
  0xfb   :  { %v144_v40 = vpop.f32.mrb[3].mxu0  ;;  %400 = vmatpush3.bf16.msra.mxu1 %v397_v38 }
  0xfc   :  { %v401_v41 = vpack.c.bf16 %v374_v39, %v144_v40 }
  0xfe   :  { %402 = vmatprep.subr.bf16.mxu1 %v401_v41 }
  0xff   :  { %404 = vmatpush3.bf16.msra.mxu1 %v401_v41 }
 0x102   :  { %384 = vmatmul.mubr.msk.f32.vlgmr.msra.gmra.mrb[0].mxu1 %vm55_vm0, %v212_v35 }
 0x103   :  { %386 = vmatprep.mubr.msk.f32.mxu1 %vm55_vm0, %v213_v43 }
 0x106   :  { %387 = vmatmul.mubr.msk.f32.gmra.mrb[2].mxu1 %vm55_vm0, %v214_v45 }
 0x1d5   :  { %v385_v46 = vpop.f32.mrb[0].mxu1 }
 0x1d6   :  { %v313_v47 = vmax.f32 %v385_v46, 0.0  ;;  %v293_v48 = vpop.f32.mrb[1].mxu1 }
 0x1d7   :  { %v312_v49 = vmax.f32 %v293_v48, 0.0 }
 0x1d8   :  { %317 = vst.msk [vmem:[#allocation5 + $0x8] sm:$0xff] %vm55_vm0, %v313_v47 }
 0x1d9   :  { %316 = vst.msk [vmem:[#allocation5] sm:$0xff] %vm55_vm0, %v312_v49  ;;  %v388_v50 = vpop.f32.mrb[2].mxu1 }
 0x1da   :  { %v315_v51 = vmax.f32 %v388_v50, 0.0  ;;  %v303_v52 = vpop.f32.mrb[3].mxu1 }
 0x1db   :  { %v314_v53 = vmax.f32 %v303_v52, 0.0 }
 0x1dc   :  { %319 = vst.msk [vmem:[#allocation5 + $0x18] sm:$0xff] %vm55_vm0, %v315_v51 }
 0x1dd   :  { %318 = vst.msk [vmem:[#allocation5 + $0x10] sm:$0xff] %vm55_vm0, %v314_v53 }
 0x1de   :  { %449 = shalt.err (!%p446_p12)
}
 0x1df   :  { %s450_s18 = scalar_lea.hbm %s563_s3, 512 }
 0x1e0   :  { %p451_p13 = scmp.ne.s32.totalorder %s563_s3, %s450_s18  ;;  %p454_p0 = scmp.lt.u32.totalorder %s450_s18, %s563_s3 }
 0x1e2   :  { %p456_p1 = pnand %p454_p0, %p451_p13 }
 0x1e4   :  { %459 = shalt.err (!%p456_p1)
}
 0x1e5   :  { %331 = dma.vmem_to_hbm [thread:$0]  %s326_s1, 512, %s563_s3, [#allocation4], %s465_s22, %s465_s22, %s466_s23  }
 0x1e6   :  { %462 = dma.done.wait [#allocation4], 512  }
 0x1e7   :  { %463 = vsyncadd [#allocation4], 4294966784 }
 0x1e8   :  { %335 = vsyncpa [#allocation3], 1 }
 0x1e9   :  { %336 = vsyncpa [#allocation4], 1 }

</bundles_post_ra>
